<compile_context>
chip_gen: v7x
topology: tpu7x:2x2x1
jax: 0.10.0
libtpu: 0.0.40
codegen_flags: <defaults>
</compile_context>

<pallas_src>
import functools

import jax
import jax.numpy as jnp
from jax.experimental import pallas as pl
from jax.experimental.pallas import tpu as pltpu


_VMEM_LIMIT = 64 * 1024 * 1024


def _round_up(x, m):
    return (x + m - 1) // m * m


def _row_tile(n):
    return 256 if n % 256 == 0 else 128


def _mlm_row_tile(n):
    for rt in (512, 256, 128):
        if n % rt == 0:
            return rt
    return 128


# Abramowitz & Stegun 7.1.26 erf approximation (max abs err ~1.5e-7), built only from
# exp/mul/add/select so it always lowers on VPU+EUP (lax.erf has no guaranteed lowering).
def _erf(x):
    a = jnp.abs(x)
    t = 1.0 / (1.0 + 0.3275911 * a)
    poly = t * (0.254829592 + t * (-0.284496736 + t * (1.421413741 +
               t * (-1.453152027 + t * 1.061405429))))
    e = 1.0 - poly * jnp.exp(-a * a)
    return jnp.where(x >= 0.0, e, -e)


def _gelu_exact(x):
    # PyTorch nn.GELU default (erf form), not the tanh approximation.
    return x * 0.5 * (1.0 + _erf(x * 0.7071067811865476))


# ----------------------------------------------------------------------------- fused linear

def _linear_kernel(*refs, act, residual, layernorm, eps):
    x_ref, w_ref, b_ref = refs[0], refs[1], refs[2]
    o_ref = refs[-1]
    i = 3
    if residual:
        res_ref = refs[i]
        i += 1
    if layernorm:
        g_ref, beta_ref = refs[i], refs[i + 1]

    y = jnp.dot(x_ref[...].astype(jnp.bfloat16), w_ref[...],
                preferred_element_type=jnp.float32) + b_ref[...]
    if act == "gelu":
        y = _gelu_exact(y)
    if residual:
        y = y + res_ref[...].astype(jnp.float32)
    if layernorm:
        mu = jnp.mean(y, axis=-1, keepdims=True)
        var = jnp.mean(jnp.square(y - mu), axis=-1, keepdims=True)
        y = (y - mu) * jax.lax.rsqrt(var + eps) * g_ref[...] + beta_ref[...]
    o_ref[...] = y.astype(o_ref.dtype)


def linear(x2d, w, b, *, act=None, residual=None, ln=None, eps=1e-12,
           out_dtype=jnp.float32):
    """y = act(x @ w + b) [+ residual] [-> layernorm], row-tiled; weight stays resident."""
    n, din = x2d.shape
    dout = w.shape[1]
    rt = _row_tile(n)
    assert n % rt == 0

    in_specs = [
        pl.BlockSpec((rt, din), lambda i: (i, 0)),
        pl.BlockSpec((din, dout), lambda i: (0, 0)),
        pl.BlockSpec((1, dout), lambda i: (0, 0)),
    ]
    args = [x2d, w, b.reshape(1, dout)]
    if residual is not None:
        in_specs.append(pl.BlockSpec((rt, dout), lambda i: (i, 0)))
        args.append(residual)
    if ln is not None:
        g, beta = ln
        in_specs.append(pl.BlockSpec((1, dout), lambda i: (0, 0)))
        in_specs.append(pl.BlockSpec((1, dout), lambda i: (0, 0)))
        args.extend([g.reshape(1, dout), beta.reshape(1, dout)])

    return pl.pallas_call(
        functools.partial(_linear_kernel, act=act,
                          residual=residual is not None,
                          layernorm=ln is not None, eps=eps),
        out_shape=jax.ShapeDtypeStruct((n, dout), out_dtype),
        grid=(n // rt,),
        in_specs=in_specs,
        out_specs=pl.BlockSpec((rt, dout), lambda i: (i, 0)),
        compiler_params=pltpu.CompilerParams(
            dimension_semantics=("parallel",),
            vmem_limit_bytes=_VMEM_LIMIT),
    )(*args)


# ----------------------------------------------------------------------------- layernorm

def _ln_kernel(x_ref, g_ref, b_ref, o_ref, *, eps):
    x = x_ref[...]
    mu = jnp.mean(x, axis=-1, keepdims=True)
    var = jnp.mean(jnp.square(x - mu), axis=-1, keepdims=True)
    o_ref[...] = ((x - mu) * jax.lax.rsqrt(var + eps) * g_ref[...]
                  + b_ref[...]).astype(o_ref.dtype)


def layernorm(x2d, g, b, eps):
    n, d = x2d.shape
    rt = _row_tile(n)
    return pl.pallas_call(
        functools.partial(_ln_kernel, eps=eps),
        out_shape=jax.ShapeDtypeStruct((n, d), jnp.float32),
        grid=(n // rt,),
        in_specs=[pl.BlockSpec((rt, d), lambda i: (i, 0)),
                  pl.BlockSpec((1, d), lambda i: (0, 0)),
                  pl.BlockSpec((1, d), lambda i: (0, 0))],
        out_specs=pl.BlockSpec((rt, d), lambda i: (i, 0)),
        compiler_params=pltpu.CompilerParams(dimension_semantics=("parallel",)),
    )(x2d, g.reshape(1, d), b.reshape(1, d))


# ----------------------------------------------------------------------------- flash attention

def _flash_attn_kernel(q_ref, k_ref, v_ref, inv_ref, kmask_ref, o_ref,
                       m_sc, l_sc, acc_sc, *, scale, tq, tk):
    qi = pl.program_id(2)
    ki = pl.program_id(3)

    @pl.when(ki == 0)
    def _():
        m_sc[...] = jnp.full_like(m_sc, -1e30)
        l_sc[...] = jnp.zeros_like(l_sc)
        acc_sc[...] = jnp.zeros_like(acc_sc)

    # (TQ, Dh) x (TK, Dh) -> (TQ, TK), contracting on Dh (bf16 MXU, f32 accumulate)
    s = jax.lax.dot_general(q_ref[...], k_ref[...], (((1,), (1,)), ((), ())),
                            preferred_element_type=jnp.float32)

    # gcdf relative-position bias, computed in-kernel from |q_pos - k_pos| (no HBM array).
    # bias = log(2*Phi(-rel/sigma) + 1e-9) = log(erfc(rel/(sigma*sqrt(2))) + 1e-9)
    qpos = qi * tq + jax.lax.broadcasted_iota(jnp.int32, (tq, tk), 0)
    kpos = ki * tk + jax.lax.broadcasted_iota(jnp.int32, (tq, tk), 1)
    rel = jnp.abs(qpos - kpos).astype(jnp.float32)
    x = rel * inv_ref[0, 0]                                   # rel / (sigma*sqrt(2)) >= 0
    t = 1.0 / (1.0 + 0.3275911 * x)
    poly = t * (0.254829592 + t * (-0.284496736 + t * (1.421413741 +
               t * (-1.453152027 + t * 1.061405429))))
    erfc = poly * jnp.exp(-x * x)                             # = 1 - erf(x)
    rel_bias = jnp.log(erfc + 1e-9)

    kmask = kmask_ref[pl.ds(ki, 1), :]                        # (1, tk) key-mask bias

    s = s * scale + rel_bias + kmask

    m_prev = m_sc[...]
    m_new = jnp.maximum(m_prev, jnp.max(s, axis=-1, keepdims=True))
    alpha = jnp.exp(m_prev - m_new)
    p = jnp.exp(s - m_new)
    l_sc[...] = alpha * l_sc[...] + jnp.sum(p, axis=-1, keepdims=True)
    acc_sc[...] = alpha * acc_sc[...] + jnp.dot(
        p.astype(jnp.bfloat16), v_ref[...], preferred_element_type=jnp.float32)
    m_sc[...] = m_new

    @pl.when(ki == pl.num_programs(3) - 1)
    def _():
        o_ref[...] = (acc_sc[...] *
                      pl.reciprocal(l_sc[...], approx=True)).astype(o_ref.dtype)


def flash_attention(q, k, v, inv_sigma, key_bias, scale, *, tq=128, tk=None):
    """q/k/v: (B,H,S,Dh) bf16; inv_sigma: (H,1,128) f32 = 1/(sigma*sqrt(2));
    key_bias: (B,S) f32 additive key-mask bias (0 or -1e9). Returns bf16 (B,H,S,Dh)."""
    B, H, S, Dh = q.shape
    tq = min(tq, S)
    if tk is None:
        tk = 256 if S % 256 == 0 else 128   # bigger kv tile helps v6e/v7x MXU fill
    tk = min(tk, S)
    nkv = S // tk
    kmask = key_bias.reshape(B, nkv, tk)     # resident per batch row, sliced per kv tile

    return pl.pallas_call(
        functools.partial(_flash_attn_kernel, scale=scale, tq=tq, tk=tk),
        out_shape=jax.ShapeDtypeStruct((B, H, S, Dh), jnp.bfloat16),
        grid=(B, H, S // tq, nkv),
        in_specs=[
            pl.BlockSpec((None, None, tq, Dh), lambda b, h, qi, ki: (b, h, qi, 0)),
            pl.BlockSpec((None, None, tk, Dh), lambda b, h, qi, ki: (b, h, ki, 0)),
            pl.BlockSpec((None, None, tk, Dh), lambda b, h, qi, ki: (b, h, ki, 0)),
            pl.BlockSpec((None, 1, 128), lambda b, h, qi, ki: (h, 0, 0)),
            pl.BlockSpec((None, nkv, tk), lambda b, h, qi, ki: (b, 0, 0)),
        ],
        out_specs=pl.BlockSpec((None, None, tq, Dh), lambda b, h, qi, ki: (b, h, qi, 0)),
        scratch_shapes=[pltpu.VMEM((tq, 1), jnp.float32),
                        pltpu.VMEM((tq, 1), jnp.float32),
                        pltpu.VMEM((tq, Dh), jnp.float32)],
        compiler_params=pltpu.CompilerParams(
            dimension_semantics=("parallel", "parallel", "parallel", "arbitrary"),
            vmem_limit_bytes=_VMEM_LIMIT),
    )(q, k, v, inv_sigma, kmask)


# ----------------------------------------------------------------------------- MLM head

def _mlm_head_kernel(h_ref, w_ref, b_ref, label_ref, loss_ref, pred_ref,
                     m_sc, l_sc, gold_sc, arg_sc, *, vt):
    vi = pl.program_id(1)

    @pl.when(vi == 0)
    def _():
        m_sc[...] = jnp.full_like(m_sc, -1e30)
        l_sc[...] = jnp.zeros_like(l_sc)
        gold_sc[...] = jnp.zeros_like(gold_sc)
        arg_sc[...] = jnp.zeros_like(arg_sc)

    logits = jnp.dot(h_ref[...].astype(jnp.bfloat16), w_ref[...],
                     preferred_element_type=jnp.float32) + b_ref[...]      # (RT, VT)
    vpos = vi * vt + jax.lax.broadcasted_iota(jnp.int32, logits.shape, 1)   # absolute vocab ids
    label = label_ref[...]                                                  # (RT, 1) int32

    # gold logit (cross-entropy numerator term)
    gold_sc[...] += jnp.sum(jnp.where(vpos == label, logits, 0.0),
                            axis=-1, keepdims=True)

    # online log-sum-exp + first-occurrence argmax
    local_max = jnp.max(logits, axis=-1, keepdims=True)
    local_arg = jnp.min(jnp.where(logits == local_max, vpos, jnp.int32(2 ** 30)),
                        axis=-1, keepdims=True)
    m_prev = m_sc[...]
    m_new = jnp.maximum(m_prev, local_max)
    l_sc[...] = l_sc[...] * jnp.exp(m_prev - m_new) + jnp.sum(
        jnp.exp(logits - m_new), axis=-1, keepdims=True)
    arg_sc[...] = jnp.where(local_max > m_prev, local_arg, arg_sc[...])
    m_sc[...] = m_new

    @pl.when(vi == pl.num_programs(1) - 1)
    def _():
        loss_ref[...] = (jnp.log(l_sc[...]) + m_sc[...]) - gold_sc[...]
        pred_ref[...] = arg_sc[...]


def mlm_head(h2d, dec_w_pad, dec_b_pad, label_col, *, vocab_tile):
    n, d = h2d.shape
    v_pad = dec_w_pad.shape[1]
    rt = _mlm_row_tile(n)        # large row tile -> decoder weight streamed fewer times
    vt = min(vocab_tile, v_pad)
    return pl.pallas_call(
        functools.partial(_mlm_head_kernel, vt=vt),
        out_shape=(jax.ShapeDtypeStruct((n, 1), jnp.float32),
                   jax.ShapeDtypeStruct((n, 1), jnp.int32)),
        grid=(n // rt, v_pad // vt),
        in_specs=[pl.BlockSpec((rt, d), lambda ri, vi: (ri, 0)),
                  pl.BlockSpec((d, vt), lambda ri, vi: (0, vi)),
                  pl.BlockSpec((1, vt), lambda ri, vi: (0, vi)),
                  pl.BlockSpec((rt, 1), lambda ri, vi: (ri, 0))],
        out_specs=(pl.BlockSpec((rt, 1), lambda ri, vi: (ri, 0)),
                   pl.BlockSpec((rt, 1), lambda ri, vi: (ri, 0))),
        scratch_shapes=[pltpu.VMEM((rt, 1), jnp.float32),
                        pltpu.VMEM((rt, 1), jnp.float32),
                        pltpu.VMEM((rt, 1), jnp.float32),
                        pltpu.VMEM((rt, 1), jnp.int32)],
        compiler_params=pltpu.CompilerParams(
            dimension_semantics=("parallel", "arbitrary"),
            vmem_limit_bytes=_VMEM_LIMIT),
    )(h2d, dec_w_pad, dec_b_pad.reshape(1, v_pad), label_col)


# ----------------------------------------------------------------------------- model

def rpe_bert_encoder(params, cfg, input_ids, input_mask, input_seg):
    B, S = input_ids.shape
    D = cfg["hidden_dim"]
    H = cfg["num_heads"]
    Dh = D // H
    eps = cfg["layer_norm_eps"]

    S_pad = _round_up(S, 128)
    pad = S_pad - S
    ids_p = jnp.pad(input_ids, ((0, 0), (0, pad)))
    seg_p = jnp.pad(input_seg, ((0, 0), (0, pad)))
    mask_p = jnp.pad(input_mask.astype(jnp.float32), ((0, 0), (0, pad)))

    # embeddings (gather is glue, plain JAX)
    emb = params["word_emb"][ids_p] + params["seg_emb"][seg_p]             # (B, S_pad, D)
    N = B * S_pad
    x2d = layernorm(emb.reshape(N, D).astype(jnp.float32),
                    params["emb_ln_g"], params["emb_ln_b"], eps)

    # per-head 1/(sigma*sqrt(2)) for the in-kernel gcdf bias (tiny resident VMEM tile)
    inv = 1.0 / (params["gcdf_sigma"] * jnp.sqrt(2.0))
    inv_sigma = jnp.broadcast_to(inv[:, None, None], (H, 1, 128)).astype(jnp.float32)
    key_bias = ((1.0 - mask_p) * (-1e9)).astype(jnp.float32)               # (B, S_pad)

    scale = float(1.0 / (Dh ** 0.5))

    for lp in params["layers"]:
        # fused QKV projection, emitted in bf16 (halves slab + transpose traffic)
        qkv = linear(x2d, lp["wqkv"], lp["bqkv"], eps=eps, out_dtype=jnp.bfloat16)
        qkv = qkv.reshape(B, S_pad, 3, H, Dh).transpose(2, 0, 3, 1, 4)       # (3,B,H,S,Dh) bf16
        q, k, v = qkv[0], qkv[1], qkv[2]

        ctx = flash_attention(q, k, v, inv_sigma, key_bias, scale)          # (B,H,S,Dh) bf16
        ctx2d = ctx.transpose(0, 2, 1, 3).reshape(N, D)                      # bf16

        # attention out-proj fused with residual add + layernorm (residual stream f32)
        x2d = linear(ctx2d, lp["wo"], lp["bo"], residual=x2d,
                     ln=(lp["ln1_g"], lp["ln1_b"]), eps=eps)
        # FFN (gelu intermediate emitted bf16)
        hmid = linear(x2d, lp["w1"], lp["b1"], act="gelu", eps=eps,
                      out_dtype=jnp.bfloat16)
        x2d = linear(hmid, lp["w2"], lp["b2"], residual=x2d,
                     ln=(lp["ln2_g"], lp["ln2_b"]), eps=eps)

    return x2d, S_pad                                                        # (B*S_pad, D)


def mlm_pretrain_forward(params, cfg, input_ids, input_mask, input_seg, label, label_mask,
                         vocab_tile=256):
    B, S = input_ids.shape
    V = cfg["vocab_size"]
    eps = cfg["layer_norm_eps"]

    enc2d, S_pad = rpe_bert_encoder(params, cfg, input_ids, input_mask, input_seg)
    N = B * S_pad

    # rep_transform + rep_layer_norm fused into one linear kernel; bf16 hidden for the head
    h2d = linear(enc2d, params["rep_w"], params["rep_b"],
                 ln=(params["rep_ln_g"], params["rep_ln_b"]), eps=eps,
                 out_dtype=jnp.bfloat16)

    # decoder weight / bias padded on the vocab axis; padded logits get -1e9 bias
    vt = min(vocab_tile, _round_up(V, 128))
    V_pad = _round_up(V, vt)
    dec_w_pad = jnp.pad(params["dec_w"], ((0, 0), (0, V_pad - V)))
    dec_b_pad = jnp.pad(params["dec_b"], (0, V_pad - V), constant_values=-1e9)

    pad = S_pad - S
    label_p = jnp.pad(label.astype(jnp.int32), ((0, 0), (0, pad))).reshape(N, 1)
    lmask_p = jnp.pad(label_mask.astype(jnp.float32), ((0, 0), (0, pad))).reshape(N)

    loss_tok, pred = mlm_head(h2d, dec_w_pad, dec_b_pad, label_p, vocab_tile=vt)

    loss_tok = loss_tok[:, 0]
    pred = pred[:, 0]
    label_flat = label_p[:, 0]

    num_predict = jnp.sum(lmask_p)
    real_loss = jnp.sum(loss_tok * lmask_p)
    num_correct = jnp.sum((pred == label_flat).astype(jnp.float32) * lmask_p)
    mean_loss = jnp.where(num_predict > 0, real_loss / num_predict, 0.0)  # div-by-zero guard
    return mean_loss, num_predict, num_correct


# ----------------------------------------------------------------------------- params

def init_params(cfg, key):
    D = cfg["hidden_dim"]
    V = cfg["vocab_size"]
    H = cfg["num_heads"]
    F = cfg["intermediate_dim"]
    L = cfg["num_layers"]
    scale = 0.02

    keys = iter(jax.random.split(key, 128))

    def nrm(shape, dtype=jnp.float32):
        return (scale * jax.random.normal(next(keys), shape, dtype=jnp.float32)).astype(dtype)

    bf16 = jnp.bfloat16
    params = {
        "word_emb": nrm((V, D)),
        "seg_emb": nrm((cfg["type_vocab_size"], D)),
        "emb_ln_g": jnp.ones((D,), jnp.float32),
        "emb_ln_b": jnp.zeros((D,), jnp.float32),
        "gcdf_sigma": 1.0 + jnp.arange(H, dtype=jnp.float32),
        "rep_w": nrm((D, D), bf16),
        "rep_b": jnp.zeros((D,), jnp.float32),
        "rep_ln_g": jnp.ones((D,), jnp.float32),
        "rep_ln_b": jnp.zeros((D,), jnp.float32),
        "dec_w": nrm((D, V), bf16),
        "dec_b": jnp.zeros((V,), jnp.float32),
        "layers": [],
    }
    for _ in range(L):
        params["layers"].append({
            "wqkv": nrm((D, 3 * D), bf16), "bqkv": jnp.zeros((3 * D,), jnp.float32),
            "wo": nrm((D, D), bf16), "bo": jnp.zeros((D,), jnp.float32),
            "ln1_g": jnp.ones((D,), jnp.float32), "ln1_b": jnp.zeros((D,), jnp.float32),
            "w1": nrm((D, F), bf16), "b1": jnp.zeros((F,), jnp.float32),
            "w2": nrm((F, D), bf16), "b2": jnp.zeros((D,), jnp.float32),
            "ln2_g": jnp.ones((D,), jnp.float32), "ln2_b": jnp.zeros((D,), jnp.float32),
        })
    return params


# ----------------------------------------------------------------------------- main

if __name__ == "__main__":
    cfg = {
        "vocab_size": 32,
        "hidden_dim": 32,
        "num_heads": 2,
        "num_layers": 2,
        "intermediate_dim": 64,
        "type_vocab_size": 2,
        "layer_norm_eps": 1e-12,
    }
    B, S = 2, 8

    key = jax.random.PRNGKey(0)
    k_param, k_ids, k_lab, k_lm = jax.random.split(key, 4)

    params = init_params(cfg, k_param)

    input_ids = jax.random.randint(k_ids, (B, S), 0, cfg["vocab_size"], dtype=jnp.int32)
    label = jax.random.randint(k_lab, (B, S), 0, cfg["vocab_size"], dtype=jnp.int32)
    input_seg = jnp.concatenate(
        [jnp.zeros((B, S // 2), jnp.int32), jnp.ones((B, S - S // 2), jnp.int32)], axis=1)
    input_mask = jnp.ones((B, S), jnp.float32).at[1, -2:].set(0.0)
    label_mask = (jax.random.uniform(k_lm, (B, S)) < 0.5).astype(jnp.float32)
    label_mask = label_mask.at[0, 0].set(1.0)  # guarantee at least one predicted token

    mean_loss, num_predict, num_correct = mlm_pretrain_forward(
        params, cfg, input_ids, input_mask, input_seg, label, label_mask)

    jax.block_until_ready((mean_loss, num_predict, num_correct))
    print("KERNEL_OK")
</pallas_src>

<mosaic_0001>
module attributes {stable_mosaic.version = 11 : i64} {
  func.func @_ln_kernel(%arg0: i32, %arg1: memref<256x32xf32, #tpu.memory_space<vmem>>, %arg2: memref<1x32xf32, #tpu.memory_space<vmem>>, %arg3: memref<1x32xf32, #tpu.memory_space<vmem>>, %arg4: memref<256x32xf32, #tpu.memory_space<vmem>>) attributes {dimension_semantics = [#tpu.dimension_semantics<parallel>], iteration_bounds = array<i64: 1>, scalar_prefetch = 0 : i64, scratch_operands = 0 : i64, tpu.core_type = #tpu.core_type<tc>, window_params = [{transform_indices = @transform_0, window_bounds = array<i64: 256, 32>}, {pipeline_mode = #tpu.pipeline_mode<synchronous>, transform_indices = @transform_1, window_bounds = array<i64: 1, 32>}, {pipeline_mode = #tpu.pipeline_mode<synchronous>, transform_indices = @transform_2, window_bounds = array<i64: 1, 32>}, {transform_indices = @transform_3, window_bounds = array<i64: 256, 32>}]} {
    %c0 = arith.constant 0 : index
    %c0_0 = arith.constant 0 : index
    %0 = vector.load %arg1[%c0, %c0_0] : memref<256x32xf32, #tpu.memory_space<vmem>>, vector<256x32xf32>
    %cst = arith.constant dense<0.000000e+00> : vector<256xf32>
    %1 = vector.multi_reduction <add>, %0, %cst [1] : vector<256x32xf32> to vector<256xf32>
    %2 = vector.shape_cast %1 : vector<256xf32> to vector<256x1xf32>
    %cst_1 = arith.constant 3.200000e+01 : f32
    %3 = vector.broadcast %cst_1 : f32 to vector<256x1xf32>
    %4 = arith.divf %2, %3 : vector<256x1xf32>
    %5 = vector.broadcast %4 : vector<256x1xf32> to vector<256x32xf32>
    %6 = arith.subf %0, %5 : vector<256x32xf32>
    %7 = arith.mulf %6, %6 : vector<256x32xf32>
    %cst_2 = arith.constant dense<0.000000e+00> : vector<256xf32>
    %8 = vector.multi_reduction <add>, %7, %cst_2 [1] : vector<256x32xf32> to vector<256xf32>
    %9 = vector.shape_cast %8 : vector<256xf32> to vector<256x1xf32>
    %cst_3 = arith.constant 3.200000e+01 : f32
    %10 = vector.broadcast %cst_3 : f32 to vector<256x1xf32>
    %11 = arith.divf %9, %10 : vector<256x1xf32>
    %12 = vector.broadcast %4 : vector<256x1xf32> to vector<256x32xf32>
    %13 = arith.subf %0, %12 : vector<256x32xf32>
    %cst_4 = arith.constant 9.99999996E-13 : f32
    %14 = vector.broadcast %cst_4 : f32 to vector<256x1xf32>
    %15 = arith.addf %11, %14 : vector<256x1xf32>
    %16 = math.rsqrt %15 : vector<256x1xf32>
    %17 = vector.broadcast %16 : vector<256x1xf32> to vector<256x32xf32>
    %18 = arith.mulf %13, %17 : vector<256x32xf32>
    %c0_5 = arith.constant 0 : index
    %c0_6 = arith.constant 0 : index
    %19 = vector.load %arg2[%c0_5, %c0_6] : memref<1x32xf32, #tpu.memory_space<vmem>>, vector<1x32xf32>
    %20 = vector.broadcast %19 : vector<1x32xf32> to vector<256x32xf32>
    %21 = arith.mulf %18, %20 : vector<256x32xf32>
    %c0_7 = arith.constant 0 : index
    %c0_8 = arith.constant 0 : index
    %22 = vector.load %arg3[%c0_7, %c0_8] : memref<1x32xf32, #tpu.memory_space<vmem>>, vector<1x32xf32>
    %23 = vector.broadcast %22 : vector<1x32xf32> to vector<256x32xf32>
    %24 = arith.addf %21, %23 : vector<256x32xf32>
    %c0_9 = arith.constant 0 : index
    %c0_10 = arith.constant 0 : index
    %25 = vector.load %arg4[%c0_9, %c0_10] : memref<256x32xf32, #tpu.memory_space<vmem>>, vector<256x32xf32>
    tpu.vector_store %arg4[%c0_9, %c0_10], %24 {strides = array<i32>} : memref<256x32xf32, #tpu.memory_space<vmem>>, vector<256x32xf32>,
    return
  }
  func.func @transform_0(%arg0: i32) -> (i32, i32) {
    %c0_i32 = arith.constant 0 : i32
    %c0_i32_0 = arith.constant 0 : i32
    return %arg0, %c0_i32 : i32, i32
  }
  func.func @transform_1(%arg0: i32) -> (i32, i32) {
    %c0_i32 = arith.constant 0 : i32
    %c0_i32_0 = arith.constant 0 : i32
    %c0_i32_1 = arith.constant 0 : i32
    return %c0_i32, %c0_i32_0 : i32, i32
  }
  func.func @transform_2(%arg0: i32) -> (i32, i32) {
    %c0_i32 = arith.constant 0 : i32
    %c0_i32_0 = arith.constant 0 : i32
    %c0_i32_1 = arith.constant 0 : i32
    return %c0_i32, %c0_i32_0 : i32, i32
  }
  func.func @transform_3(%arg0: i32) -> (i32, i32) {
    %c0_i32 = arith.constant 0 : i32
    %c0_i32_0 = arith.constant 0 : i32
    return %arg0, %c0_i32 : i32, i32
  }
}

</mosaic_0001>

<bundles_post_ra>
// kernel: tpu_custom_call.1
= control target key start
LH: loop header
LB: loop body
LE: loop exit
PB: predicated region body
PF: predicated region fallthrough
CT: control target
= control target key end

     0   :  { %vm46_vm0 = vcmask 261120   ;;  %s1314_s0 = inlined_call_operand.vmem [shape: f32[256,32], index: 0, kind: input, shape index: {}]   ;;  %s1315_s1 = inlined_call_operand.vmem [shape: f32[1,32], index: 1, kind: input, shape index: {}]   ;;  %s1316_s2 = inlined_call_operand.vmem [shape: f32[1,32], index: 2, kind: input, shape index: {}]   ;;  %s1317_s3 = inlined_call_operand.vmem [shape: f32[256,32], index: 3, kind: output, shape index: {}]  }
   0x1   :  { %v667_v0 = vld [vmem:[%s1314_s0] sm:$0xff]  ;;  %v672_v1 = vld [vmem:[%s1314_s0 + $0x10] sm:$0xff]  ;;  %v677_v2 = vld [vmem:[%s1314_s0 + $0x8] sm:$0xff] }
   0x2   :  { %v47_v3 = vsel %vm46_vm0, %v667_v0, 0.0  ;;  %v53_v4 = vsel %vm46_vm0, %v672_v1, 0.0  ;;  %v686_v5 = vld [vmem:[%s1314_s0 + $0x18] sm:$0xff]  ;;  %v50_v6 = vsel %vm46_vm0, %v677_v2, 0.0  ;;  %v695_v8 = vld [vmem:[%s1314_s0 + $0x20] sm:$0xff]  ;;  %v700_v9 = vld [vmem:[%s1314_s0 + $0x28] sm:$0xff] }
   0x3   :  { %48 = vadd.xlane.f32.xlu0 %v47_v3  ;;  %54 = vadd.xlane.f32.xlu1 %v53_v4  ;;  %v56_v7 = vsel %vm46_vm0, %v686_v5, 0.0  ;;  %v59_v10 = vsel %vm46_vm0, %v695_v8, 0.0  ;;  %v62_v11 = vsel %vm46_vm0, %v700_v9, 0.0  ;;  %v709_v12 = vld [vmem:[%s1314_s0 + $0x30] sm:$0xff]  ;;  %v714_v13 = vld [vmem:[%s1314_s0 + $0x38] sm:$0xff]  ;;  %v723_v16 = vld [vmem:[%s1314_s0 + $0x40] sm:$0xff] }
   0x4   :  { %v65_v14 = vsel %vm46_vm0, %v709_v12, 0.0  ;;  %v68_v15 = vsel %vm46_vm0, %v714_v13, 0.0  ;;  %v728_v17 = vld [vmem:[%s1314_s0 + $0x48] sm:$0xff]  ;;  %v71_v18 = vsel %vm46_vm0, %v723_v16, 0.0  ;;  %v737_v20 = vld [vmem:[%s1314_s0 + $0x50] sm:$0xff]  ;;  %v742_v21 = vld [vmem:[%s1314_s0 + $0x58] sm:$0xff] }
   0x5   :  { %v74_v19 = vsel %vm46_vm0, %v728_v17, 0.0  ;;  %v77_v22 = vsel %vm46_vm0, %v737_v20, 0.0  ;;  %v80_v23 = vsel %vm46_vm0, %v742_v21, 0.0  ;;  %v751_v24 = vld [vmem:[%s1314_s0 + $0x60] sm:$0xff]  ;;  %v756_v25 = vld [vmem:[%s1314_s0 + $0x68] sm:$0xff]  ;;  %v765_v28 = vld [vmem:[%s1314_s0 + $0x70] sm:$0xff] }
   0x6   :  { %v83_v26 = vsel %vm46_vm0, %v751_v24, 0.0  ;;  %v86_v27 = vsel %vm46_vm0, %v756_v25, 0.0  ;;  %v770_v29 = vld [vmem:[%s1314_s0 + $0x78] sm:$0xff]  ;;  %v89_v30 = vsel %vm46_vm0, %v765_v28, 0.0  ;;  %v779_v32 = vld [vmem:[%s1314_s0 + $0x80] sm:$0xff]  ;;  %v784_v33 = vld [vmem:[%s1314_s0 + $0x88] sm:$0xff] }
   0x7   :  { %51 = vadd.xlane.f32.xlu0 %v50_v6  ;;  %57 = vadd.xlane.f32.xlu1 %v56_v7  ;;  %v92_v31 = vsel %vm46_vm0, %v770_v29, 0.0  ;;  %v95_v34 = vsel %vm46_vm0, %v779_v32, 0.0  ;;  %v98_v35 = vsel %vm46_vm0, %v784_v33, 0.0  ;;  %v793_v36 = vld [vmem:[%s1314_s0 + $0x90] sm:$0xff]  ;;  %v798_v37 = vld [vmem:[%s1314_s0 + $0x98] sm:$0xff]  ;;  %v807_v40 = vld [vmem:[%s1314_s0 + $0xa0] sm:$0xff] }
   0x8   :  { %v101_v38 = vsel %vm46_vm0, %v793_v36, 0.0  ;;  %v104_v39 = vsel %vm46_vm0, %v798_v37, 0.0  ;;  %v812_v41 = vld [vmem:[%s1314_s0 + $0xa8] sm:$0xff]  ;;  %v107_v42 = vsel %vm46_vm0, %v807_v40, 0.0  ;;  %v821_v44 = vld [vmem:[%s1314_s0 + $0xb0] sm:$0xff]  ;;  %v826_v45 = vld [vmem:[%s1314_s0 + $0xb8] sm:$0xff] }
   0x9   :  { %v110_v43 = vsel %vm46_vm0, %v812_v41, 0.0  ;;  %v113_v46 = vsel %vm46_vm0, %v821_v44, 0.0  ;;  %v116_v47 = vsel %vm46_vm0, %v826_v45, 0.0  ;;  %v835_v48 = vld [vmem:[%s1314_s0 + $0xc0] sm:$0xff]  ;;  %v840_v49 = vld [vmem:[%s1314_s0 + $0xc8] sm:$0xff]  ;;  %v849_v52 = vld [vmem:[%s1314_s0 + $0xd0] sm:$0xff] }
   0xa   :  { %v119_v50 = vsel %vm46_vm0, %v835_v48, 0.0  ;;  %v122_v51 = vsel %vm46_vm0, %v840_v49, 0.0  ;;  %v854_v53 = vld [vmem:[%s1314_s0 + $0xd8] sm:$0xff]  ;;  %v125_v54 = vsel %vm46_vm0, %v849_v52, 0.0  ;;  %v863_v56 = vld [vmem:[%s1314_s0 + $0xe0] sm:$0xff]  ;;  %v868_v57 = vld [vmem:[%s1314_s0 + $0xe8] sm:$0xff] }
   0xb   :  { %60 = vadd.xlane.f32.xlu0 %v59_v10  ;;  %63 = vadd.xlane.f32.xlu1 %v62_v11  ;;  %v128_v55 = vsel %vm46_vm0, %v854_v53, 0.0  ;;  %v131_v58 = vsel %vm46_vm0, %v863_v56, 0.0  ;;  %v134_v59 = vsel %vm46_vm0, %v868_v57, 0.0  ;;  %v877_v60 = vld [vmem:[%s1314_s0 + $0xf0] sm:$0xff]  ;;  %v882_v61 = vld [vmem:[%s1314_s0 + $0xf8] sm:$0xff] }
   0xc   :  { %v137_v62 = vsel %vm46_vm0, %v877_v60, 0.0  ;;  %v140_v63 = vsel %vm46_vm0, %v882_v61, 0.0 }
   0xf   :  { %66 = vadd.xlane.f32.xlu0 %v65_v14  ;;  %69 = vadd.xlane.f32.xlu1 %v68_v15 }
  0x13   :  { %72 = vadd.xlane.f32.xlu0 %v71_v18  ;;  %75 = vadd.xlane.f32.xlu1 %v74_v19 }
  0x17   :  { %78 = vadd.xlane.f32.xlu0 %v77_v22  ;;  %81 = vadd.xlane.f32.xlu1 %v80_v23 }
  0x1b   :  { %84 = vadd.xlane.f32.xlu0 %v83_v26  ;;  %87 = vadd.xlane.f32.xlu1 %v86_v27 }
  0x1f   :  { %90 = vadd.xlane.f32.xlu0 %v89_v30  ;;  %93 = vadd.xlane.f32.xlu1 %v92_v31 }
  0x23   :  { %96 = vadd.xlane.f32.xlu0 %v95_v34  ;;  %99 = vadd.xlane.f32.xlu1 %v98_v35 }
  0x27   :  { %102 = vadd.xlane.f32.xlu0 %v101_v38  ;;  %105 = vadd.xlane.f32.xlu1 %v104_v39 }
  0x2b   :  { %108 = vadd.xlane.f32.xlu0 %v107_v42  ;;  %111 = vadd.xlane.f32.xlu1 %v110_v43 }
  0x2f   :  { %114 = vadd.xlane.f32.xlu0 %v113_v46  ;;  %117 = vadd.xlane.f32.xlu1 %v116_v47 }
  0x33   :  { %120 = vadd.xlane.f32.xlu0 %v119_v50  ;;  %123 = vadd.xlane.f32.xlu1 %v122_v51 }
  0x37   :  { %126 = vadd.xlane.f32.xlu0 %v125_v54  ;;  %129 = vadd.xlane.f32.xlu1 %v128_v55 }
  0x3b   :  { %132 = vadd.xlane.f32.xlu0 %v131_v58  ;;  %135 = vadd.xlane.f32.xlu1 %v134_v59 }
  0x3f   :  { %138 = vadd.xlane.f32.xlu0 %v137_v62  ;;  %141 = vadd.xlane.f32.xlu1 %v140_v63 }
  0x90   :  { %v49_v3 = vpop.xlane.xlu0 %48  ;;  %v55_v4 = vpop.xlane.xlu1 %54 }
  0x91   :  { %v144_v6 = vmul.f32 0.03125, %v49_v3  ;;  %v146_v7 = vmul.f32 0.03125, %v55_v4 }
  0x93   :  { %v889_v10 = vsub.f32 %v667_v0, %v144_v6  ;;  %v892_v11 = vsub.f32 %v672_v1, %v146_v7 }
  0x94   :  { %v52_v14 = vpop.xlane.xlu0 %51  ;;  %v58_v15 = vpop.xlane.xlu1 %57 }
  0x95   :  { %v145_v18 = vmul.f32 0.03125, %v52_v14  ;;  %v147_v19 = vmul.f32 0.03125, %v58_v15  ;;  %v208_v22 = vmul.f32 %v889_v10, %v889_v10  ;;  %v210_v23 = vmul.f32 %v892_v11, %v892_v11 }
  0x97   :  { %v899_v26 = vsub.f32 %v677_v2, %v145_v18  ;;  %v902_v27 = vsub.f32 %v686_v5, %v147_v19  ;;  %v240_v0 = vsel %vm46_vm0, %v208_v22, 0.0  ;;  %v246_v31 = vsel %vm46_vm0, %v210_v23, 0.0 }
  0x98   :  { %241 = vadd.xlane.f32.xlu0 %v240_v0  ;;  %v61_v1 = vpop.xlane.xlu0 %60  ;;  %v64_v30 = vpop.xlane.xlu1 %63 }
  0x99   :  { %v148_v34 = vmul.f32 0.03125, %v61_v1  ;;  %v149_v35 = vmul.f32 0.03125, %v64_v30  ;;  %v209_v38 = vmul.f32 %v899_v26, %v899_v26  ;;  %v211_v39 = vmul.f32 %v902_v27, %v902_v27 }
  0x9b   :  { %v911_v2 = vsub.f32 %v695_v8, %v148_v34  ;;  %v914_v5 = vsub.f32 %v700_v9, %v149_v35  ;;  %v243_v42 = vsel %vm46_vm0, %v209_v38, 0.0  ;;  %v249_v47 = vsel %vm46_vm0, %v211_v39, 0.0 }
  0x9c   :  { %247 = vadd.xlane.f32.xlu0 %v246_v31  ;;  %244 = vadd.xlane.f32.xlu1 %v243_v42  ;;  %v67_v43 = vpop.xlane.xlu0 %66  ;;  %v70_v46 = vpop.xlane.xlu1 %69 }
  0x9d   :  { %v150_v50 = vmul.f32 0.03125, %v67_v43  ;;  %v151_v51 = vmul.f32 0.03125, %v70_v46  ;;  %v212_v54 = vmul.f32 %v911_v2, %v911_v2  ;;  %v213_v8 = vmul.f32 %v914_v5, %v914_v5 }
  0x9f   :  { %v923_v55 = vsub.f32 %v709_v12, %v150_v50  ;;  %v926_v9 = vsub.f32 %v714_v13, %v151_v51  ;;  %v252_v58 = vsel %vm46_vm0, %v212_v54, 0.0  ;;  %v255_v63 = vsel %vm46_vm0, %v213_v8, 0.0 }
  0xa0   :  { %250 = vadd.xlane.f32.xlu1 %v249_v47  ;;  %253 = vadd.xlane.f32.xlu0 %v252_v58  ;;  %v73_v59 = vpop.xlane.xlu0 %72  ;;  %v76_v62 = vpop.xlane.xlu1 %75 }
  0xa1   :  { %v152_v3 = vmul.f32 0.03125, %v73_v59  ;;  %v153_v4 = vmul.f32 0.03125, %v76_v62  ;;  %v214_v6 = vmul.f32 %v923_v55, %v923_v55  ;;  %v215_v12 = vmul.f32 %v926_v9, %v926_v9 }
  0xa3   :  { %v935_v7 = vsub.f32 %v723_v16, %v152_v3  ;;  %v938_v13 = vsub.f32 %v728_v17, %v153_v4  ;;  %v258_v14 = vsel %vm46_vm0, %v214_v6, 0.0  ;;  %v261_v19 = vsel %vm46_vm0, %v215_v12, 0.0 }
  0xa4   :  { %256 = vadd.xlane.f32.xlu1 %v255_v63  ;;  %259 = vadd.xlane.f32.xlu0 %v258_v14  ;;  %v79_v15 = vpop.xlane.xlu0 %78  ;;  %v82_v18 = vpop.xlane.xlu1 %81 }
  0xa5   :  { %v154_v22 = vmul.f32 0.03125, %v79_v15  ;;  %v155_v23 = vmul.f32 0.03125, %v82_v18  ;;  %v216_v0 = vmul.f32 %v935_v7, %v935_v7  ;;  %v217_v16 = vmul.f32 %v938_v13, %v938_v13 }
  0xa7   :  { %v947_v1 = vsub.f32 %v737_v20, %v154_v22  ;;  %v950_v17 = vsub.f32 %v742_v21, %v155_v23  ;;  %v264_v30 = vsel %vm46_vm0, %v216_v0, 0.0  ;;  %v267_v35 = vsel %vm46_vm0, %v217_v16, 0.0 }
  0xa8   :  { %262 = vadd.xlane.f32.xlu1 %v261_v19  ;;  %265 = vadd.xlane.f32.xlu0 %v264_v30  ;;  %v85_v31 = vpop.xlane.xlu0 %84  ;;  %v88_v34 = vpop.xlane.xlu1 %87 }
  0xa9   :  { %v156_v38 = vmul.f32 0.03125, %v85_v31  ;;  %v157_v39 = vmul.f32 0.03125, %v88_v34  ;;  %v218_v42 = vmul.f32 %v947_v1, %v947_v1  ;;  %v219_v20 = vmul.f32 %v950_v17, %v950_v17 }
  0xab   :  { %v959_v43 = vsub.f32 %v751_v24, %v156_v38  ;;  %v962_v21 = vsub.f32 %v756_v25, %v157_v39  ;;  %v270_v46 = vsel %vm46_vm0, %v218_v42, 0.0  ;;  %v273_v51 = vsel %vm46_vm0, %v219_v20, 0.0 }
  0xac   :  { %268 = vadd.xlane.f32.xlu1 %v267_v35  ;;  %271 = vadd.xlane.f32.xlu0 %v270_v46  ;;  %v91_v47 = vpop.xlane.xlu0 %90  ;;  %v94_v50 = vpop.xlane.xlu1 %93 }
  0xad   :  { %v158_v54 = vmul.f32 0.03125, %v91_v47  ;;  %v159_v8 = vmul.f32 0.03125, %v94_v50  ;;  %v220_v58 = vmul.f32 %v959_v43, %v959_v43  ;;  %v221_v24 = vmul.f32 %v962_v21, %v962_v21 }
  0xaf   :  { %v971_v59 = vsub.f32 %v765_v28, %v158_v54  ;;  %v974_v25 = vsub.f32 %v770_v29, %v159_v8  ;;  %v276_v62 = vsel %vm46_vm0, %v220_v58, 0.0  ;;  %v279_v4 = vsel %vm46_vm0, %v221_v24, 0.0 }
  0xb0   :  { %274 = vadd.xlane.f32.xlu1 %v273_v51  ;;  %277 = vadd.xlane.f32.xlu0 %v276_v62  ;;  %v97_v63 = vpop.xlane.xlu0 %96  ;;  %v100_v3 = vpop.xlane.xlu1 %99 }
  0xb1   :  { %v160_v6 = vmul.f32 0.03125, %v97_v63  ;;  %v161_v12 = vmul.f32 0.03125, %v100_v3  ;;  %v222_v14 = vmul.f32 %v971_v59, %v971_v59  ;;  %v223_v28 = vmul.f32 %v974_v25, %v974_v25 }
  0xb3   :  { %v983_v15 = vsub.f32 %v779_v32, %v160_v6  ;;  %v986_v29 = vsub.f32 %v784_v33, %v161_v12  ;;  %v282_v18 = vsel %vm46_vm0, %v222_v14, 0.0  ;;  %v285_v23 = vsel %vm46_vm0, %v223_v28, 0.0 }
  0xb4   :  { %280 = vadd.xlane.f32.xlu1 %v279_v4  ;;  %283 = vadd.xlane.f32.xlu0 %v282_v18  ;;  %v103_v19 = vpop.xlane.xlu0 %102  ;;  %v106_v22 = vpop.xlane.xlu1 %105 }
  0xb5   :  { %v162_v0 = vmul.f32 0.03125, %v103_v19  ;;  %v163_v16 = vmul.f32 0.03125, %v106_v22  ;;  %v224_v30 = vmul.f32 %v983_v15, %v983_v15  ;;  %v225_v32 = vmul.f32 %v986_v29, %v986_v29 }
  0xb7   :  { %v995_v31 = vsub.f32 %v793_v36, %v162_v0  ;;  %v998_v33 = vsub.f32 %v798_v37, %v163_v16  ;;  %v288_v34 = vsel %vm46_vm0, %v224_v30, 0.0  ;;  %v291_v39 = vsel %vm46_vm0, %v225_v32, 0.0 }
  0xb8   :  { %286 = vadd.xlane.f32.xlu1 %v285_v23  ;;  %289 = vadd.xlane.f32.xlu0 %v288_v34  ;;  %v109_v35 = vpop.xlane.xlu0 %108  ;;  %v112_v38 = vpop.xlane.xlu1 %111 }
  0xb9   :  { %v164_v42 = vmul.f32 0.03125, %v109_v35  ;;  %v165_v20 = vmul.f32 0.03125, %v112_v38  ;;  %v226_v46 = vmul.f32 %v995_v31, %v995_v31  ;;  %v227_v36 = vmul.f32 %v998_v33, %v998_v33 }
  0xbb   :  { %v1007_v47 = vsub.f32 %v807_v40, %v164_v42  ;;  %v1010_v37 = vsub.f32 %v812_v41, %v165_v20  ;;  %v294_v50 = vsel %vm46_vm0, %v226_v46, 0.0  ;;  %v297_v8 = vsel %vm46_vm0, %v227_v36, 0.0 }
  0xbc   :  { %292 = vadd.xlane.f32.xlu1 %v291_v39  ;;  %295 = vadd.xlane.f32.xlu0 %v294_v50  ;;  %v115_v51 = vpop.xlane.xlu0 %114  ;;  %v118_v54 = vpop.xlane.xlu1 %117 }
  0xbd   :  { %v166_v58 = vmul.f32 0.03125, %v115_v51  ;;  %v167_v24 = vmul.f32 0.03125, %v118_v54  ;;  %v228_v62 = vmul.f32 %v1007_v47, %v1007_v47  ;;  %v229_v40 = vmul.f32 %v1010_v37, %v1010_v37 }
  0xbf   :  { %v1019_v63 = vsub.f32 %v821_v44, %v166_v58  ;;  %v1022_v41 = vsub.f32 %v826_v45, %v167_v24  ;;  %v300_v3 = vsel %vm46_vm0, %v228_v62, 0.0  ;;  %v303_v12 = vsel %vm46_vm0, %v229_v40, 0.0 }
  0xc0   :  { %298 = vadd.xlane.f32.xlu1 %v297_v8  ;;  %301 = vadd.xlane.f32.xlu0 %v300_v3  ;;  %v121_v4 = vpop.xlane.xlu0 %120  ;;  %v124_v6 = vpop.xlane.xlu1 %123 }
  0xc1   :  { %v168_v14 = vmul.f32 0.03125, %v121_v4  ;;  %v169_v28 = vmul.f32 0.03125, %v124_v6  ;;  %v230_v18 = vmul.f32 %v1019_v63, %v1019_v63  ;;  %v231_v44 = vmul.f32 %v1022_v41, %v1022_v41 }
  0xc3   :  { %v1031_v19 = vsub.f32 %v835_v48, %v168_v14  ;;  %v1034_v45 = vsub.f32 %v840_v49, %v169_v28  ;;  %v306_v22 = vsel %vm46_vm0, %v230_v18, 0.0  ;;  %v309_v16 = vsel %vm46_vm0, %v231_v44, 0.0 }
  0xc4   :  { %304 = vadd.xlane.f32.xlu1 %v303_v12  ;;  %307 = vadd.xlane.f32.xlu0 %v306_v22  ;;  %v127_v23 = vpop.xlane.xlu0 %126  ;;  %v130_v0 = vpop.xlane.xlu1 %129 }
  0xc5   :  { %v170_v30 = vmul.f32 0.03125, %v127_v23  ;;  %v171_v32 = vmul.f32 0.03125, %v130_v0  ;;  %v232_v34 = vmul.f32 %v1031_v19, %v1031_v19  ;;  %v233_v48 = vmul.f32 %v1034_v45, %v1034_v45 }
  0xc7   :  { %v1043_v35 = vsub.f32 %v849_v52, %v170_v30  ;;  %v1046_v49 = vsub.f32 %v854_v53, %v171_v32  ;;  %v312_v38 = vsel %vm46_vm0, %v232_v34, 0.0  ;;  %v315_v20 = vsel %vm46_vm0, %v233_v48, 0.0 }
  0xc8   :  { %310 = vadd.xlane.f32.xlu1 %v309_v16  ;;  %313 = vadd.xlane.f32.xlu0 %v312_v38  ;;  %v133_v39 = vpop.xlane.xlu0 %132  ;;  %v136_v42 = vpop.xlane.xlu1 %135 }
  0xc9   :  { %v172_v46 = vmul.f32 0.03125, %v133_v39  ;;  %v173_v36 = vmul.f32 0.03125, %v136_v42  ;;  %v234_v50 = vmul.f32 %v1043_v35, %v1043_v35  ;;  %v235_v52 = vmul.f32 %v1046_v49, %v1046_v49 }
  0xcb   :  { %v1055_v51 = vsub.f32 %v863_v56, %v172_v46  ;;  %v1058_v53 = vsub.f32 %v868_v57, %v173_v36  ;;  %v318_v54 = vsel %vm46_vm0, %v234_v50, 0.0  ;;  %v321_v24 = vsel %vm46_vm0, %v235_v52, 0.0 }
  0xcc   :  { %316 = vadd.xlane.f32.xlu1 %v315_v20  ;;  %319 = vadd.xlane.f32.xlu0 %v318_v54  ;;  %v139_v8 = vpop.xlane.xlu0 %138  ;;  %v142_v58 = vpop.xlane.xlu1 %141 }
  0xcd   :  { %v174_v62 = vmul.f32 0.03125, %v139_v8  ;;  %v175_v40 = vmul.f32 0.03125, %v142_v58  ;;  %v236_v3 = vmul.f32 %v1055_v51, %v1055_v51  ;;  %v237_v56 = vmul.f32 %v1058_v53, %v1058_v53  ;;  %v1083_v58 = vld [vmem:[%s1315_s1] ss:$0 sm:$0xff] }
  0xcf   :  { %v1067_v4 = vsub.f32 %v877_v60, %v174_v62  ;;  %v1070_v57 = vsub.f32 %v882_v61, %v175_v40  ;;  %v324_v6 = vsel %vm46_vm0, %v236_v3, 0.0  ;;  %v327_v12 = vsel %vm46_vm0, %v237_v56, 0.0 }
  0xd0   :  { %322 = vadd.xlane.f32.xlu1 %v321_v24  ;;  %325 = vadd.xlane.f32.xlu0 %v324_v6  ;;  %v1089_v6 = vld [vmem:[%s1316_s2] ss:$0 sm:$0xff] }
  0xd1   :  { %v238_v14 = vmul.f32 %v1067_v4, %v1067_v4  ;;  %v239_v28 = vmul.f32 %v1070_v57, %v1070_v57 }
  0xd3   :  { %v330_v18 = vsel %vm46_vm0, %v238_v14, 0.0  ;;  %v333_v60 = vsel %vm46_vm0, %v239_v28, 0.0 }
  0xd4   :  { %328 = vadd.xlane.f32.xlu1 %v327_v12  ;;  %331 = vadd.xlane.f32.xlu0 %v330_v18 }
  0xd8   :  { %334 = vadd.xlane.f32.xlu1 %v333_v60 }
 0x125   :  { %v242_v61 = vpop.xlane.xlu0 %241 }
 0x126   :  { %v336_v44 = vmul.f32 0.03125, %v242_v61 }
 0x128   :  { %v368_v22 = vadd.f32 1e-12, %v336_v44 }
 0x129   :  { %v245_v23 = vpop.xlane.xlu1 %244  ;;  %v248_v0 = vpop.xlane.xlu0 %247 }
 0x12a   :  { %580 = vrsqrt.f32 %v368_v22  ;;  %v337_v16 = vmul.f32 0.03125, %v245_v23  ;;  %v338_v30 = vmul.f32 0.03125, %v248_v0 }
 0x12c   :  { %v369_v32 = vadd.f32 1e-12, %v337_v16  ;;  %v370_v34 = vadd.f32 1e-12, %v338_v30 }
 0x12d   :  { %v251_v48 = vpop.xlane.xlu1 %250  ;;  %v254_v38 = vpop.xlane.xlu0 %253 }
 0x12e   :  { %582 = vrsqrt.f32 %v369_v32  ;;  %v339_v39 = vmul.f32 0.03125, %v251_v48  ;;  %v340_v42 = vmul.f32 0.03125, %v254_v38 }
 0x12f   :  { %584 = vrsqrt.f32 %v370_v34 }
 0x130   :  { %v371_v20 = vadd.f32 1e-12, %v339_v39  ;;  %v372_v46 = vadd.f32 1e-12, %v340_v42 }
 0x131   :  { %v257_v36 = vpop.xlane.xlu1 %256  ;;  %v260_v50 = vpop.xlane.xlu0 %259 }
 0x132   :  { %586 = vrsqrt.f32 %v371_v20  ;;  %v341_v52 = vmul.f32 0.03125, %v257_v36  ;;  %v342_v54 = vmul.f32 0.03125, %v260_v50 }
 0x133   :  { %588 = vrsqrt.f32 %v372_v46 }
 0x134   :  { %v581_v8 = vpop.eup %580  ;;  %v373_v24 = vadd.f32 1e-12, %v341_v52  ;;  %v374_v62 = vadd.f32 1e-12, %v342_v54 }
 0x135   :  { %v432_v40 = vmul.f32 %v581_v8, %v889_v10  ;;  %v263_v3 = vpop.xlane.xlu1 %262  ;;  %v266_v56 = vpop.xlane.xlu0 %265 }
 0x136   :  { %590 = vrsqrt.f32 %v373_v24  ;;  %v343_v12 = vmul.f32 0.03125, %v263_v3  ;;  %v344_v14 = vmul.f32 0.03125, %v266_v56 }
 0x137   :  { %v471_v28 = vmul.f32 %v1083_v58, %v432_v40  ;;  %592 = vrsqrt.f32 %v374_v62 }
 0x138   :  { %v583_v18 = vpop.eup %582  ;;  %v375_v60 = vadd.f32 1e-12, %v343_v12  ;;  %v376_v61 = vadd.f32 1e-12, %v344_v14 }
 0x139   :  { %v585_v44 = vpop.eup %584  ;;  %v510_v22 = vadd.f32 %v1089_v6, %v471_v28  ;;  %v433_v10 = vmul.f32 %v583_v18, %v899_v26  ;;  %v269_v23 = vpop.xlane.xlu1 %268 }
 0x13a   :  { %v272_v0 = vpop.xlane.xlu0 %271  ;;  %v434_v16 = vmul.f32 %v585_v44, %v892_v11  ;;  %594 = vrsqrt.f32 %v375_v60  ;;  %v345_v30 = vmul.f32 0.03125, %v269_v23 }
 0x13b   :  { %v346_v32 = vmul.f32 0.03125, %v272_v0  ;;  %542 = vst.msk [vmem:[%s1317_s3] sm:$0xff] %vm46_vm0, %v510_v22  ;;  %v472_v34 = vmul.f32 %v1083_v58, %v433_v10  ;;  %596 = vrsqrt.f32 %v376_v61 }
 0x13c   :  { %v587_v48 = vpop.eup %586  ;;  %v473_v38 = vmul.f32 %v1083_v58, %v434_v16  ;;  %v377_v39 = vadd.f32 1e-12, %v345_v30 }
 0x13d   :  { %v378_v26 = vadd.f32 1e-12, %v346_v32  ;;  %v589_v42 = vpop.eup %588  ;;  %v511_v20 = vadd.f32 %v1089_v6, %v472_v34  ;;  %v435_v11 = vmul.f32 %v587_v48, %v902_v27  ;;  %v275_v46 = vpop.xlane.xlu1 %274 }
 0x13e   :  { %v278_v36 = vpop.xlane.xlu0 %277  ;;  %v512_v50 = vadd.f32 %v1089_v6, %v473_v38  ;;  %v436_v52 = vmul.f32 %v589_v42, %v911_v2  ;;  %598 = vrsqrt.f32 %v377_v39  ;;  %v347_v54 = vmul.f32 0.03125, %v275_v46 }
 0x13f   :  { %543 = vst.msk [vmem:[%s1317_s3 + $0x8] sm:$0xff] %vm46_vm0, %v511_v20  ;;  %v474_v8 = vmul.f32 %v1083_v58, %v435_v11  ;;  %600 = vrsqrt.f32 %v378_v26  ;;  %v348_v24 = vmul.f32 0.03125, %v278_v36 }
 0x140   :  { %v591_v62 = vpop.eup %590  ;;  %544 = vst.msk [vmem:[%s1317_s3 + $0x10] sm:$0xff] %vm46_vm0, %v512_v50  ;;  %v475_v27 = vmul.f32 %v1083_v58, %v436_v52  ;;  %v379_v2 = vadd.f32 1e-12, %v347_v54 }
 0x141   :  { %v593_v40 = vpop.eup %592  ;;  %v513_v3 = vadd.f32 %v1089_v6, %v474_v8  ;;  %v437_v56 = vmul.f32 %v591_v62, %v914_v5  ;;  %v380_v12 = vadd.f32 1e-12, %v348_v24  ;;  %v281_v14 = vpop.xlane.xlu1 %280 }
 0x142   :  { %v284_v28 = vpop.xlane.xlu0 %283  ;;  %v514_v18 = vadd.f32 %v1089_v6, %v475_v27  ;;  %v438_v60 = vmul.f32 %v593_v40, %v923_v55  ;;  %602 = vrsqrt.f32 %v379_v2  ;;  %v349_v61 = vmul.f32 0.03125, %v281_v14 }
 0x143   :  { %545 = vst.msk [vmem:[%s1317_s3 + $0x18] sm:$0xff] %vm46_vm0, %v513_v3  ;;  %v476_v44 = vmul.f32 %v1083_v58, %v437_v56  ;;  %604 = vrsqrt.f32 %v380_v12  ;;  %v350_v22 = vmul.f32 0.03125, %v284_v28 }
 0x144   :  { %v595_v10 = vpop.eup %594  ;;  %546 = vst.msk [vmem:[%s1317_s3 + $0x20] sm:$0xff] %vm46_vm0, %v514_v18  ;;  %v477_v5 = vmul.f32 %v1083_v58, %v438_v60  ;;  %v381_v55 = vadd.f32 1e-12, %v349_v61 }
 0x145   :  { %v597_v23 = vpop.eup %596  ;;  %v515_v0 = vadd.f32 %v1089_v6, %v476_v44  ;;  %v439_v16 = vmul.f32 %v595_v10, %v926_v9  ;;  %v382_v30 = vadd.f32 1e-12, %v350_v22  ;;  %v287_v32 = vpop.xlane.xlu1 %286 }
 0x146   :  { %v290_v34 = vpop.xlane.xlu0 %289  ;;  %v516_v48 = vadd.f32 %v1089_v6, %v477_v5  ;;  %v440_v38 = vmul.f32 %v597_v23, %v935_v7  ;;  %606 = vrsqrt.f32 %v381_v55  ;;  %v351_v39 = vmul.f32 0.03125, %v287_v32 }
 0x147   :  { %547 = vst.msk [vmem:[%s1317_s3 + $0x28] sm:$0xff] %vm46_vm0, %v515_v0  ;;  %v478_v26 = vmul.f32 %v1083_v58, %v439_v16  ;;  %608 = vrsqrt.f32 %v382_v30  ;;  %v352_v42 = vmul.f32 0.03125, %v290_v34 }
 0x148   :  { %v599_v20 = vpop.eup %598  ;;  %548 = vst.msk [vmem:[%s1317_s3 + $0x30] sm:$0xff] %vm46_vm0, %v516_v48  ;;  %v479_v9 = vmul.f32 %v1083_v58, %v440_v38  ;;  %v383_v7 = vadd.f32 1e-12, %v351_v39 }
 0x149   :  { %v601_v11 = vpop.eup %600  ;;  %v517_v46 = vadd.f32 %v1089_v6, %v478_v26  ;;  %v441_v36 = vmul.f32 %v599_v20, %v938_v13  ;;  %v384_v50 = vadd.f32 1e-12, %v352_v42  ;;  %v293_v52 = vpop.xlane.xlu1 %292 }
 0x14a   :  { %v296_v54 = vpop.xlane.xlu0 %295  ;;  %v518_v8 = vadd.f32 %v1089_v6, %v479_v9  ;;  %v442_v24 = vmul.f32 %v601_v11, %v947_v1  ;;  %610 = vrsqrt.f32 %v383_v7  ;;  %v353_v62 = vmul.f32 0.03125, %v293_v52 }
 0x14b   :  { %549 = vst.msk [vmem:[%s1317_s3 + $0x38] sm:$0xff] %vm46_vm0, %v517_v46  ;;  %v480_v27 = vmul.f32 %v1083_v58, %v441_v36  ;;  %612 = vrsqrt.f32 %v384_v50  ;;  %v354_v2 = vmul.f32 0.03125, %v296_v54 }
 0x14c   :  { %v603_v40 = vpop.eup %602  ;;  %550 = vst.msk [vmem:[%s1317_s3 + $0x40] sm:$0xff] %vm46_vm0, %v518_v8  ;;  %v481_v13 = vmul.f32 %v1083_v58, %v442_v24  ;;  %v385_v1 = vadd.f32 1e-12, %v353_v62 }
 0x14d   :  { %v605_v3 = vpop.eup %604  ;;  %v519_v56 = vadd.f32 %v1089_v6, %v480_v27  ;;  %v443_v12 = vmul.f32 %v603_v40, %v950_v17  ;;  %v386_v14 = vadd.f32 1e-12, %v354_v2  ;;  %v299_v28 = vpop.xlane.xlu1 %298 }
 0x14e   :  { %v302_v18 = vpop.xlane.xlu0 %301  ;;  %v520_v60 = vadd.f32 %v1089_v6, %v481_v13  ;;  %v444_v61 = vmul.f32 %v605_v3, %v959_v43  ;;  %614 = vrsqrt.f32 %v385_v1  ;;  %v355_v44 = vmul.f32 0.03125, %v299_v28 }
 0x14f   :  { %551 = vst.msk [vmem:[%s1317_s3 + $0x48] sm:$0xff] %vm46_vm0, %v519_v56  ;;  %v482_v22 = vmul.f32 %v1083_v58, %v443_v12  ;;  %616 = vrsqrt.f32 %v386_v14  ;;  %v356_v10 = vmul.f32 0.03125, %v302_v18 }
 0x150   :  { %v607_v5 = vpop.eup %606  ;;  %552 = vst.msk [vmem:[%s1317_s3 + $0x50] sm:$0xff] %vm46_vm0, %v520_v60  ;;  %v483_v17 = vmul.f32 %v1083_v58, %v444_v61  ;;  %v387_v43 = vadd.f32 1e-12, %v355_v44 }
 0x151   :  { %v609_v55 = vpop.eup %608  ;;  %v521_v23 = vadd.f32 %v1089_v6, %v482_v22  ;;  %v445_v0 = vmul.f32 %v607_v5, %v962_v21  ;;  %v388_v16 = vadd.f32 1e-12, %v356_v10  ;;  %v305_v30 = vpop.xlane.xlu1 %304 }
 0x152   :  { %v308_v32 = vpop.xlane.xlu0 %307  ;;  %v522_v34 = vadd.f32 %v1089_v6, %v483_v17  ;;  %v446_v48 = vmul.f32 %v609_v55, %v971_v59  ;;  %618 = vrsqrt.f32 %v387_v43  ;;  %v357_v38 = vmul.f32 0.03125, %v305_v30 }
 0x153   :  { %553 = vst.msk [vmem:[%s1317_s3 + $0x58] sm:$0xff] %vm46_vm0, %v521_v23  ;;  %v484_v39 = vmul.f32 %v1083_v58, %v445_v0  ;;  %620 = vrsqrt.f32 %v388_v16  ;;  %v358_v26 = vmul.f32 0.03125, %v308_v32 }
 0x154   :  { %v611_v42 = vpop.eup %610  ;;  %554 = vst.msk [vmem:[%s1317_s3 + $0x60] sm:$0xff] %vm46_vm0, %v522_v34  ;;  %v485_v21 = vmul.f32 %v1083_v58, %v446_v48  ;;  %v389_v59 = vadd.f32 1e-12, %v357_v38 }
 0x155   :  { %v613_v20 = vpop.eup %612  ;;  %v523_v9 = vadd.f32 %v1089_v6, %v484_v39  ;;  %v447_v7 = vmul.f32 %v611_v42, %v974_v25  ;;  %v390_v11 = vadd.f32 1e-12, %v358_v26  ;;  %v311_v46 = vpop.xlane.xlu1 %310 }
 0x156   :  { %v314_v36 = vpop.xlane.xlu0 %313  ;;  %v524_v50 = vadd.f32 %v1089_v6, %v485_v21  ;;  %v448_v52 = vmul.f32 %v613_v20, %v983_v15  ;;  %622 = vrsqrt.f32 %v389_v59  ;;  %v359_v54 = vmul.f32 0.03125, %v311_v46 }
 0x157   :  { %555 = vst.msk [vmem:[%s1317_s3 + $0x68] sm:$0xff] %vm46_vm0, %v523_v9  ;;  %v486_v8 = vmul.f32 %v1083_v58, %v447_v7  ;;  %624 = vrsqrt.f32 %v390_v11  ;;  %v360_v24 = vmul.f32 0.03125, %v314_v36 }
 0x158   :  { %v615_v62 = vpop.eup %614  ;;  %556 = vst.msk [vmem:[%s1317_s3 + $0x70] sm:$0xff] %vm46_vm0, %v524_v50  ;;  %v487_v25 = vmul.f32 %v1083_v58, %v448_v52  ;;  %v391_v15 = vadd.f32 1e-12, %v359_v54 }
 0x159   :  { %v617_v27 = vpop.eup %616  ;;  %v525_v2 = vadd.f32 %v1089_v6, %v486_v8  ;;  %v449_v40 = vmul.f32 %v615_v62, %v986_v29  ;;  %v392_v13 = vadd.f32 1e-12, %v360_v24  ;;  %v317_v1 = vpop.xlane.xlu1 %316 }
 0x15a   :  { %v320_v3 = vpop.xlane.xlu0 %319  ;;  %v526_v56 = vadd.f32 %v1089_v6, %v487_v25  ;;  %v450_v12 = vmul.f32 %v617_v27, %v995_v31  ;;  %626 = vrsqrt.f32 %v391_v15  ;;  %v361_v14 = vmul.f32 0.03125, %v317_v1 }
 0x15b   :  { %557 = vst.msk [vmem:[%s1317_s3 + $0x78] sm:$0xff] %vm46_vm0, %v525_v2  ;;  %v488_v28 = vmul.f32 %v1083_v58, %v449_v40  ;;  %628 = vrsqrt.f32 %v392_v13  ;;  %v362_v18 = vmul.f32 0.03125, %v320_v3 }
 0x15c   :  { %v619_v60 = vpop.eup %618  ;;  %558 = vst.msk [vmem:[%s1317_s3 + $0x80] sm:$0xff] %vm46_vm0, %v526_v56  ;;  %v489_v29 = vmul.f32 %v1083_v58, %v450_v12  ;;  %v393_v31 = vadd.f32 1e-12, %v361_v14 }
 0x15d   :  { %v621_v61 = vpop.eup %620  ;;  %v527_v44 = vadd.f32 %v1089_v6, %v488_v28  ;;  %v451_v22 = vmul.f32 %v619_v60, %v998_v33  ;;  %v394_v10 = vadd.f32 1e-12, %v362_v18  ;;  %v323_v5 = vpop.xlane.xlu1 %322 }
 0x15e   :  { %v326_v17 = vpop.xlane.xlu0 %325  ;;  %v528_v43 = vadd.f32 %v1089_v6, %v489_v29  ;;  %v452_v55 = vmul.f32 %v621_v61, %v1007_v47  ;;  %630 = vrsqrt.f32 %v393_v31  ;;  %v363_v23 = vmul.f32 0.03125, %v323_v5 }
 0x15f   :  { %559 = vst.msk [vmem:[%s1317_s3 + $0x88] sm:$0xff] %vm46_vm0, %v527_v44  ;;  %v490_v0 = vmul.f32 %v1083_v58, %v451_v22  ;;  %632 = vrsqrt.f32 %v394_v10  ;;  %v364_v16 = vmul.f32 0.03125, %v326_v17 }
 0x160   :  { %v623_v30 = vpop.eup %622  ;;  %560 = vst.msk [vmem:[%s1317_s3 + $0x90] sm:$0xff] %vm46_vm0, %v528_v43  ;;  %v491_v33 = vmul.f32 %v1083_v58, %v452_v55  ;;  %v395_v47 = vadd.f32 1e-12, %v363_v23 }
 0x161   :  { %v625_v32 = vpop.eup %624  ;;  %v529_v34 = vadd.f32 %v1089_v6, %v490_v0  ;;  %v453_v48 = vmul.f32 %v623_v30, %v1010_v37  ;;  %v396_v38 = vadd.f32 1e-12, %v364_v16  ;;  %v329_v39 = vpop.xlane.xlu1 %328 }
 0x162   :  { %v332_v26 = vpop.xlane.xlu0 %331  ;;  %v530_v42 = vadd.f32 %v1089_v6, %v491_v33  ;;  %v454_v21 = vmul.f32 %v625_v32, %v1019_v63  ;;  %634 = vrsqrt.f32 %v395_v47  ;;  %v365_v59 = vmul.f32 0.03125, %v329_v39 }
 0x163   :  { %561 = vst.msk [vmem:[%s1317_s3 + $0x98] sm:$0xff] %vm46_vm0, %v529_v34  ;;  %v492_v20 = vmul.f32 %v1083_v58, %v453_v48  ;;  %636 = vrsqrt.f32 %v396_v38  ;;  %v366_v9 = vmul.f32 0.03125, %v332_v26 }
 0x164   :  { %v627_v7 = vpop.eup %626  ;;  %562 = vst.msk [vmem:[%s1317_s3 + $0xa0] sm:$0xff] %vm46_vm0, %v530_v42  ;;  %v493_v37 = vmul.f32 %v1083_v58, %v454_v21  ;;  %v397_v63 = vadd.f32 1e-12, %v365_v59 }
 0x165   :  { %v629_v11 = vpop.eup %628  ;;  %v531_v46 = vadd.f32 %v1089_v6, %v492_v20  ;;  %v455_v36 = vmul.f32 %v627_v7, %v1022_v41  ;;  %v398_v50 = vadd.f32 1e-12, %v366_v9  ;;  %v335_v52 = vpop.xlane.xlu1 %334 }
 0x166   :  { %v532_v54 = vadd.f32 %v1089_v6, %v493_v37  ;;  %v456_v8 = vmul.f32 %v629_v11, %v1031_v19  ;;  %638 = vrsqrt.f32 %v397_v63  ;;  %v367_v24 = vmul.f32 0.03125, %v335_v52 }
 0x167   :  { %563 = vst.msk [vmem:[%s1317_s3 + $0xa8] sm:$0xff] %vm46_vm0, %v531_v46  ;;  %v494_v62 = vmul.f32 %v1083_v58, %v455_v36  ;;  %640 = vrsqrt.f32 %v398_v50 }
 0x168   :  { %v631_v25 = vpop.eup %630  ;;  %564 = vst.msk [vmem:[%s1317_s3 + $0xb0] sm:$0xff] %vm46_vm0, %v532_v54  ;;  %v495_v41 = vmul.f32 %v1083_v58, %v456_v8  ;;  %v399_v15 = vadd.f32 1e-12, %v367_v24 }
 0x169   :  { %v633_v19 = vpop.eup %632  ;;  %v533_v27 = vadd.f32 %v1089_v6, %v494_v62  ;;  %v457_v2 = vmul.f32 %v631_v25, %v1034_v45 }
 0x16a   :  { %v534_v40 = vadd.f32 %v1089_v6, %v495_v41  ;;  %v458_v13 = vmul.f32 %v633_v19, %v1043_v35  ;;  %642 = vrsqrt.f32 %v399_v15 }
 0x16b   :  { %565 = vst.msk [vmem:[%s1317_s3 + $0xb8] sm:$0xff] %vm46_vm0, %v533_v27  ;;  %v496_v1 = vmul.f32 %v1083_v58, %v457_v2 }
 0x16c   :  { %v635_v3 = vpop.eup %634  ;;  %566 = vst.msk [vmem:[%s1317_s3 + $0xc0] sm:$0xff] %vm46_vm0, %v534_v40  ;;  %v497_v45 = vmul.f32 %v1083_v58, %v458_v13 }
 0x16d   :  { %v637_v56 = vpop.eup %636  ;;  %v535_v12 = vadd.f32 %v1089_v6, %v496_v1  ;;  %v459_v35 = vmul.f32 %v635_v3, %v1046_v49 }
 0x16e   :  { %v536_v14 = vadd.f32 %v1089_v6, %v497_v45  ;;  %v460_v28 = vmul.f32 %v637_v56, %v1055_v51 }
 0x16f   :  { %567 = vst.msk [vmem:[%s1317_s3 + $0xc8] sm:$0xff] %vm46_vm0, %v535_v12  ;;  %v498_v18 = vmul.f32 %v1083_v58, %v459_v35 }
 0x170   :  { %v639_v60 = vpop.eup %638  ;;  %568 = vst.msk [vmem:[%s1317_s3 + $0xd0] sm:$0xff] %vm46_vm0, %v536_v14  ;;  %v499_v29 = vmul.f32 %v1083_v58, %v460_v28 }
 0x171   :  { %v641_v49 = vpop.eup %640  ;;  %v537_v31 = vadd.f32 %v1089_v6, %v498_v18  ;;  %v461_v51 = vmul.f32 %v639_v60, %v1058_v53 }
 0x172   :  { %v538_v61 = vadd.f32 %v1089_v6, %v499_v29  ;;  %v462_v44 = vmul.f32 %v641_v49, %v1067_v4 }
 0x173   :  { %569 = vst.msk [vmem:[%s1317_s3 + $0xd8] sm:$0xff] %vm46_vm0, %v537_v31  ;;  %v500_v22 = vmul.f32 %v1083_v58, %v461_v51 }
 0x174   :  { %v643_v10 = vpop.eup %642  ;;  %570 = vst.msk [vmem:[%s1317_s3 + $0xe0] sm:$0xff] %vm46_vm0, %v538_v61  ;;  %v501_v5 = vmul.f32 %v1083_v58, %v462_v44 }
 0x175   :  { %v539_v53 = vadd.f32 %v1089_v6, %v500_v22  ;;  %v463_v17 = vmul.f32 %v643_v10, %v1070_v57 }
 0x176   :  { %v540_v4 = vadd.f32 %v1089_v6, %v501_v5 }
 0x177   :  { %571 = vst.msk [vmem:[%s1317_s3 + $0xe8] sm:$0xff] %vm46_vm0, %v539_v53  ;;  %v502_v43 = vmul.f32 %v1083_v58, %v463_v17 }
 0x178   :  { %572 = vst.msk [vmem:[%s1317_s3 + $0xf0] sm:$0xff] %vm46_vm0, %v540_v4 }
 0x179   :  { %v541_v55 = vadd.f32 %v1089_v6, %v502_v43 }
 0x17b   :  { %573 = vst.msk [vmem:[%s1317_s3 + $0xf8] sm:$0xff] %vm46_vm0, %v541_v55 }

</bundles_post_ra>
